<compile_context>
chip_gen: v6e
topology: v6e:2x2x1
jax: 0.10.0
libtpu: 0.0.40
codegen_flags: <defaults>
</compile_context>

<pallas_src>
import jax
import jax.numpy as jnp
from jax.experimental import pallas as pl
from jax.experimental.pallas import tpu as pltpu
from dataclasses import dataclass


@dataclass
class NerModelConfig:
    labelling_type: str = "ce"
    num_tags: int = 8


def _divisible_tile(dim: int, preferred: int, align: int) -> int:
    """Largest tile <= preferred that divides dim and is a multiple of `align`.
    Falls back to the full dim (which waives the (8,128) tiling constraint)."""
    if dim >= align and dim % align == 0:
        t = max(align, (min(dim, preferred) // align) * align)
        while dim % t != 0:
            t -= align
        return t
    return dim


def _choose_launch(B: int, S: int, T: int):
    """Pick (tb, ts, n_split) under an explicit VMEM budget with >=2 parallel blocks."""
    # Batch tile: aim for >= 4 (at least 2) batch blocks so v7x's 2 TCs both get work.
    if B % 8 == 0 and B >= 32:
        tb = _divisible_tile(B, max(8, min(128, B // 4)), 8)
    elif B % 8 == 0 and B >= 16:
        tb = _divisible_tile(B, max(8, B // 2), 8)
    else:
        tb = _divisible_tile(B, 128, 8)
    n_bblk = B // tb

    # Seq tile: prefer 2048 but cap so the f32 feats working block stays <= ~4 MiB
    # (double-buffered native block + f32 intermediates comfortably under v7x VMEM).
    budget_f32_elems = (4 << 20) // 4
    ts_cap = max(128, budget_f32_elems // max(1, tb * T))
    ts = _divisible_tile(S, min(2048, ts_cap), 128)
    n_sblk = S // ts

    # Outer seq-split "parallel" axis only if the batch axis has a single block.
    n_split = 1
    if n_bblk < 2:
        for cand in (4, 2):
            if n_sblk % cand == 0:
                n_split = cand
                break
    return tb, ts, n_split


def _ce_loss_kernel(feats_ref, tags_ref, mask_ref, loss_ref, cnt_ref):
    # feats_ref: (T, tb, ts)  native dtype -- tokens on lanes, batch on sublanes,
    #                                         tags on the untiled leading axis
    # tags_ref : (tb, ts)     int32
    # mask_ref : (tb, ts)     int8
    # loss_ref : (1, tb, 1)   f32  per-(split,batch) masked-NLL partial sum (resident)
    # cnt_ref  : (1, tb, 1)   f32  per-(split,batch) mask-count partial sum (resident)
    si = pl.program_id(2)

    @pl.when(si == 0)
    def _init():
        loss_ref[...] = jnp.zeros_like(loss_ref)
        cnt_ref[...] = jnp.zeros_like(cnt_ref)

    T = feats_ref.shape[0]

    # Upcast in-kernel (VPU, rides under DMA slack); HBM traffic stays native width.
    logits = feats_ref[...].astype(jnp.float32)                  # (T, tb, ts)

    # Numerically stable log-sum-exp over the tag axis: plain VALU ops over T planes.
    m = jnp.max(logits, axis=0)                                  # (tb, ts)
    p = jnp.exp(logits - m[None, :, :])                          # lane-dense exp (EUP)
    lse = jnp.log(jnp.sum(p, axis=0)) + m                        # (tb, ts)

    # Gold-tag logit: static unroll over tag planes; no tile-sized iota / one-hot.
    tag_ids = tags_ref[...]                                      # (tb, ts) int32
    gold = jnp.zeros_like(lse)
    for t in range(T):
        gold = gold + jnp.where(tag_ids == t, logits[t], 0.0)

    maskf = (mask_ref[...] != 0).astype(jnp.float32)             # (tb, ts)
    nll = (lse - gold) * maskf                                   # per-token masked CE

    loss_ref[...] += jnp.sum(nll, axis=-1, keepdims=True)[None]  # (1, tb, 1)
    cnt_ref[...] += jnp.sum(maskf, axis=-1, keepdims=True)[None]


class TaggingLayer:
    def __init__(self, config: NerModelConfig):
        assert config.labelling_type == "ce", "only 'ce' branch implemented in Pallas"
        self.config = config

    def forward(self, feats, mask, tags, *, feats_in_tbs: bool = False):
        # feats: (S, B, T) -- or (T, B, S) if feats_in_tbs (preferred: emit this layout
        # at the producing projection and skip the extra HBM relayout pass entirely).
        # mask: (S, B), tags: (B, S)
        if feats_in_tbs:
            feats_tbs = feats
            T, B, S = feats.shape
        else:
            S, B, T = feats.shape
            feats_tbs = jnp.transpose(feats, (2, 1, 0))          # (T, B, S), native dtype
        assert T == self.config.num_tags

        tags_bs = tags.astype(jnp.int32)                         # (B, S)
        mask_bs = jnp.transpose(mask, (1, 0)).astype(jnp.int8)   # (B, S), 1 byte/elt

        tb, ts, n_split = _choose_launch(B, S, T)
        n_bblk = B // tb
        n_sblk = S // ts
        nsps = n_sblk // n_split                                 # seq tiles per split
        grid = (n_split, n_bblk, nsps)

        itemsize = jnp.dtype(feats_tbs.dtype).itemsize
        feats_blk_native = T * tb * ts * itemsize
        feats_blk_f32 = T * tb * ts * 4
        small_blk = tb * ts * 5                                  # tags(i32) + mask(i8)
        est = 2 * feats_blk_native + 2 * small_blk + 4 * feats_blk_f32 + (1 << 20)
        vmem_limit = int(min(48 << 20, max(32 << 20, est)))

        cost = pl.CostEstimate(
            flops=int(8 * B * S * T),
            transcendentals=int(B * S * (T + 1)),
            bytes_accessed=int(B * S * T * itemsize + B * S * 5 + 2 * n_split * B * 4),
        )

        loss_part, cnt_part = pl.pallas_call(
            _ce_loss_kernel,
            out_shape=(
                jax.ShapeDtypeStruct((n_split, B, 1), jnp.float32),
                jax.ShapeDtypeStruct((n_split, B, 1), jnp.float32),
            ),
            grid_spec=pltpu.PrefetchScalarGridSpec(
                num_scalar_prefetch=0,
                grid=grid,
                in_specs=[
                    pl.BlockSpec((T, tb, ts),
                                 lambda p, bi, si: (0, bi, p * nsps + si)),
                    pl.BlockSpec((tb, ts),
                                 lambda p, bi, si: (bi, p * nsps + si)),
                    pl.BlockSpec((tb, ts),
                                 lambda p, bi, si: (bi, p * nsps + si)),
                ],
                out_specs=(
                    pl.BlockSpec((1, tb, 1), lambda p, bi, si: (p, bi, 0)),
                    pl.BlockSpec((1, tb, 1), lambda p, bi, si: (p, bi, 0)),
                ),
            ),
            compiler_params=pltpu.CompilerParams(
                dimension_semantics=("parallel", "parallel", "arbitrary"),
                vmem_limit_bytes=vmem_limit),
            cost_estimate=cost,
        )(feats_tbs, tags_bs, mask_bs)

        # Combine per-split partials and apply the *global* normalization
        # (mask.float().sum() in the PyTorch code) on tiny vectors outside the kernel.
        loss_sum = jnp.sum(loss_part, axis=0)[:, 0]              # (B,)
        total_mask = jnp.sum(cnt_part)                           # scalar
        return loss_sum / total_mask

    __call__ = forward


def _reference_ce_loss(feats, mask, tags, num_tags):
    # pure-JAX reference mirroring the PyTorch code exactly
    S, B, T = feats.shape
    f = jnp.transpose(feats, (1, 0, 2)).reshape(-1, num_tags)            # (B*S, T)
    t = tags.reshape(-1)                                                 # (B*S,)
    logp = jax.nn.log_softmax(f.astype(jnp.float32), axis=-1)
    nll = -jnp.take_along_axis(logp, t[:, None], axis=-1)[:, 0]          # (B*S,)
    loss = nll.reshape(B, S) * jnp.transpose(mask, (1, 0)).astype(jnp.float32)
    return jnp.sum(loss, axis=-1) / jnp.sum(mask.astype(jnp.float32))


if __name__ == "__main__":
    key = jax.random.PRNGKey(0)
    seq_len, batch, num_tags = 8, 2, 8

    k1, k2, k3 = jax.random.split(key, 3)
    feats = jax.random.normal(k1, (seq_len, batch, num_tags), dtype=jnp.float32)
    tags = jax.random.randint(k2, (batch, seq_len), 0, num_tags, dtype=jnp.int32)
    # mask: first few tokens valid per sequence
    lengths = jnp.array([seq_len, seq_len - 3], dtype=jnp.int32)          # (batch,)
    mask = (jnp.arange(seq_len)[:, None] < lengths[None, :])              # (S, B) bool

    config = NerModelConfig(labelling_type="ce", num_tags=num_tags)
    layer = TaggingLayer(config)

    out = layer(feats, mask, tags)
    out = jax.block_until_ready(out)

    ref = _reference_ce_loss(feats, mask, tags, num_tags)
    assert out.shape == (batch,)
    assert jnp.allclose(out, ref, atol=1e-5, rtol=1e-5), (out, ref)

    print("KERNEL_OK")
</pallas_src>

<mosaic_0001>
module attributes {stable_mosaic.version = 11 : i64} {
  func.func @_ce_loss_kernel(%arg0: i32, %arg1: i32, %arg2: i32, %arg3: memref<8x2x8xf32, #tpu.memory_space<vmem>>, %arg4: memref<2x8xi32, #tpu.memory_space<vmem>>, %arg5: memref<2x8xi8, #tpu.memory_space<vmem>>, %arg6: memref<1x2x1xf32, #tpu.memory_space<vmem>>, %arg7: memref<1x2x1xf32, #tpu.memory_space<vmem>>) attributes {dimension_semantics = [#tpu.dimension_semantics<parallel>, #tpu.dimension_semantics<parallel>, #tpu.dimension_semantics<arbitrary>], iteration_bounds = array<i64: 1, 1, 1>, scalar_prefetch = 0 : i64, scratch_operands = 0 : i64, tpu.core_type = #tpu.core_type<tc>, window_params = [{transform_indices = @transform_0, window_bounds = array<i64: 8, 2, 8>}, {transform_indices = @transform_1, window_bounds = array<i64: 2, 8>}, {transform_indices = @transform_2, window_bounds = array<i64: 2, 8>}, {transform_indices = @transform_3, window_bounds = array<i64: 1, 2, 1>}, {transform_indices = @transform_4, window_bounds = array<i64: 1, 2, 1>}]} {
    %c0_i32 = arith.constant 0 : i32
    %0 = arith.cmpi eq, %arg2, %c0_i32 : i32
    %1 = arith.extui %0 : i1 to i32
    %c0_i32_0 = arith.constant 0 : i32
    %2 = arith.cmpi ne, %1, %c0_i32_0 : i32
    scf.if %2 {
      %cst_32 = arith.constant 0.000000e+00 : f32
      %89 = vector.broadcast %cst_32 : f32 to vector<1x2x1xf32>
      %c0_33 = arith.constant 0 : index
      %c0_34 = arith.constant 0 : index
      %c0_35 = arith.constant 0 : index
      %90 = vector.load %arg6[%c0_33, %c0_34, %c0_35] : memref<1x2x1xf32, #tpu.memory_space<vmem>>, vector<1x2x1xf32>
      tpu.vector_store %arg6[%c0_33, %c0_34, %c0_35], %89 {strides = array<i32>} : memref<1x2x1xf32, #tpu.memory_space<vmem>>, vector<1x2x1xf32>,
      %cst_36 = arith.constant 0.000000e+00 : f32
      %91 = vector.broadcast %cst_36 : f32 to vector<1x2x1xf32>
      %c0_37 = arith.constant 0 : index
      %c0_38 = arith.constant 0 : index
      %c0_39 = arith.constant 0 : index
      %92 = vector.load %arg7[%c0_37, %c0_38, %c0_39] : memref<1x2x1xf32, #tpu.memory_space<vmem>>, vector<1x2x1xf32>
      tpu.vector_store %arg7[%c0_37, %c0_38, %c0_39], %91 {strides = array<i32>} : memref<1x2x1xf32, #tpu.memory_space<vmem>>, vector<1x2x1xf32>,
    } else {
    }
    %c0 = arith.constant 0 : index
    %c0_1 = arith.constant 0 : index
    %c0_2 = arith.constant 0 : index
    %3 = vector.load %arg3[%c0, %c0_1, %c0_2] : memref<8x2x8xf32, #tpu.memory_space<vmem>>, vector<8x2x8xf32>
    %cst = arith.constant dense<0xFF800000> : vector<2x8xf32>
    %4 = vector.multi_reduction <maximumf>, %3, %cst [0] : vector<8x2x8xf32> to vector<2x8xf32>
    %5 = vector.shape_cast %4 : vector<2x8xf32> to vector<1x2x8xf32>
    %6 = vector.broadcast %5 : vector<1x2x8xf32> to vector<8x2x8xf32>
    %7 = arith.subf %3, %6 : vector<8x2x8xf32>
    %8 = math.exp %7 : vector<8x2x8xf32>
    %cst_3 = arith.constant dense<0.000000e+00> : vector<2x8xf32>
    %9 = vector.multi_reduction <add>, %8, %cst_3 [0] : vector<8x2x8xf32> to vector<2x8xf32>
    %10 = math.log %9 : vector<2x8xf32>
    %11 = arith.addf %10, %4 : vector<2x8xf32>
    %c0_4 = arith.constant 0 : index
    %c0_5 = arith.constant 0 : index
    %12 = vector.load %arg4[%c0_4, %c0_5] : memref<2x8xi32, #tpu.memory_space<vmem>>, vector<2x8xi32>
    %cst_6 = arith.constant 0.000000e+00 : f32
    %13 = vector.broadcast %cst_6 : f32 to vector<2x8xf32>
    %c0_i32_7 = arith.constant 0 : i32
    %14 = vector.broadcast %c0_i32_7 : i32 to vector<2x8xi32>
    %15 = arith.cmpi eq, %12, %14 : vector<2x8xi32>
    %16 = vector.extract_strided_slice %3 {offsets = [0, 0, 0], sizes = [1, 2, 8], strides = [1, 1, 1]} : vector<8x2x8xf32> to vector<1x2x8xf32>
    %17 = vector.shape_cast %16 : vector<1x2x8xf32> to vector<2x8xf32>
    %cst_8 = arith.constant 0.000000e+00 : f32
    %18 = vector.broadcast %cst_8 : f32 to vector<2x8xf32>
    %19 = arith.select %15, %17, %18 : vector<2x8xi1>, vector<2x8xf32>
    %20 = arith.addf %13, %19 : vector<2x8xf32>
    %c1_i32 = arith.constant 1 : i32
    %21 = vector.broadcast %c1_i32 : i32 to vector<2x8xi32>
    %22 = arith.cmpi eq, %12, %21 : vector<2x8xi32>
    %23 = vector.extract_strided_slice %3 {offsets = [1, 0, 0], sizes = [1, 2, 8], strides = [1, 1, 1]} : vector<8x2x8xf32> to vector<1x2x8xf32>
    %24 = vector.shape_cast %23 : vector<1x2x8xf32> to vector<2x8xf32>
    %cst_9 = arith.constant 0.000000e+00 : f32
    %25 = vector.broadcast %cst_9 : f32 to vector<2x8xf32>
    %26 = arith.select %22, %24, %25 : vector<2x8xi1>, vector<2x8xf32>
    %27 = arith.addf %20, %26 : vector<2x8xf32>
    %c2_i32 = arith.constant 2 : i32
    %28 = vector.broadcast %c2_i32 : i32 to vector<2x8xi32>
    %29 = arith.cmpi eq, %12, %28 : vector<2x8xi32>
    %30 = vector.extract_strided_slice %3 {offsets = [2, 0, 0], sizes = [1, 2, 8], strides = [1, 1, 1]} : vector<8x2x8xf32> to vector<1x2x8xf32>
    %31 = vector.shape_cast %30 : vector<1x2x8xf32> to vector<2x8xf32>
    %cst_10 = arith.constant 0.000000e+00 : f32
    %32 = vector.broadcast %cst_10 : f32 to vector<2x8xf32>
    %33 = arith.select %29, %31, %32 : vector<2x8xi1>, vector<2x8xf32>
    %34 = arith.addf %27, %33 : vector<2x8xf32>
    %c3_i32 = arith.constant 3 : i32
    %35 = vector.broadcast %c3_i32 : i32 to vector<2x8xi32>
    %36 = arith.cmpi eq, %12, %35 : vector<2x8xi32>
    %37 = vector.extract_strided_slice %3 {offsets = [3, 0, 0], sizes = [1, 2, 8], strides = [1, 1, 1]} : vector<8x2x8xf32> to vector<1x2x8xf32>
    %38 = vector.shape_cast %37 : vector<1x2x8xf32> to vector<2x8xf32>
    %cst_11 = arith.constant 0.000000e+00 : f32
    %39 = vector.broadcast %cst_11 : f32 to vector<2x8xf32>
    %40 = arith.select %36, %38, %39 : vector<2x8xi1>, vector<2x8xf32>
    %41 = arith.addf %34, %40 : vector<2x8xf32>
    %c4_i32 = arith.constant 4 : i32
    %42 = vector.broadcast %c4_i32 : i32 to vector<2x8xi32>
    %43 = arith.cmpi eq, %12, %42 : vector<2x8xi32>
    %44 = vector.extract_strided_slice %3 {offsets = [4, 0, 0], sizes = [1, 2, 8], strides = [1, 1, 1]} : vector<8x2x8xf32> to vector<1x2x8xf32>
    %45 = vector.shape_cast %44 : vector<1x2x8xf32> to vector<2x8xf32>
    %cst_12 = arith.constant 0.000000e+00 : f32
    %46 = vector.broadcast %cst_12 : f32 to vector<2x8xf32>
    %47 = arith.select %43, %45, %46 : vector<2x8xi1>, vector<2x8xf32>
    %48 = arith.addf %41, %47 : vector<2x8xf32>
    %c5_i32 = arith.constant 5 : i32
    %49 = vector.broadcast %c5_i32 : i32 to vector<2x8xi32>
    %50 = arith.cmpi eq, %12, %49 : vector<2x8xi32>
    %51 = vector.extract_strided_slice %3 {offsets = [5, 0, 0], sizes = [1, 2, 8], strides = [1, 1, 1]} : vector<8x2x8xf32> to vector<1x2x8xf32>
    %52 = vector.shape_cast %51 : vector<1x2x8xf32> to vector<2x8xf32>
    %cst_13 = arith.constant 0.000000e+00 : f32
    %53 = vector.broadcast %cst_13 : f32 to vector<2x8xf32>
    %54 = arith.select %50, %52, %53 : vector<2x8xi1>, vector<2x8xf32>
    %55 = arith.addf %48, %54 : vector<2x8xf32>
    %c6_i32 = arith.constant 6 : i32
    %56 = vector.broadcast %c6_i32 : i32 to vector<2x8xi32>
    %57 = arith.cmpi eq, %12, %56 : vector<2x8xi32>
    %58 = vector.extract_strided_slice %3 {offsets = [6, 0, 0], sizes = [1, 2, 8], strides = [1, 1, 1]} : vector<8x2x8xf32> to vector<1x2x8xf32>
    %59 = vector.shape_cast %58 : vector<1x2x8xf32> to vector<2x8xf32>
    %cst_14 = arith.constant 0.000000e+00 : f32
    %60 = vector.broadcast %cst_14 : f32 to vector<2x8xf32>
    %61 = arith.select %57, %59, %60 : vector<2x8xi1>, vector<2x8xf32>
    %62 = arith.addf %55, %61 : vector<2x8xf32>
    %c7_i32 = arith.constant 7 : i32
    %63 = vector.broadcast %c7_i32 : i32 to vector<2x8xi32>
    %64 = arith.cmpi eq, %12, %63 : vector<2x8xi32>
    %65 = vector.extract_strided_slice %3 {offsets = [7, 0, 0], sizes = [1, 2, 8], strides = [1, 1, 1]} : vector<8x2x8xf32> to vector<1x2x8xf32>
    %66 = vector.shape_cast %65 : vector<1x2x8xf32> to vector<2x8xf32>
    %cst_15 = arith.constant 0.000000e+00 : f32
    %67 = vector.broadcast %cst_15 : f32 to vector<2x8xf32>
    %68 = arith.select %64, %66, %67 : vector<2x8xi1>, vector<2x8xf32>
    %69 = arith.addf %62, %68 : vector<2x8xf32>
    %c0_16 = arith.constant 0 : index
    %c0_17 = arith.constant 0 : index
    %70 = vector.load %arg5[%c0_16, %c0_17] : memref<2x8xi8, #tpu.memory_space<vmem>>, vector<2x8xi8>
    %c0_i8 = arith.constant 0 : i8
    %71 = vector.broadcast %c0_i8 : i8 to vector<2x8xi8>
    %72 = arith.cmpi ne, %70, %71 : vector<2x8xi8>
    %73 = arith.extui %72 : vector<2x8xi1> to vector<2x8xi32>
    %74 = arith.sitofp %73 : vector<2x8xi32> to vector<2x8xf32>
    %75 = arith.subf %11, %69 : vector<2x8xf32>
    %76 = arith.mulf %75, %74 : vector<2x8xf32>
    %c0_18 = arith.constant 0 : index
    %c0_19 = arith.constant 0 : index
    %c0_20 = arith.constant 0 : index
    %77 = vector.load %arg6[%c0_18, %c0_19, %c0_20] : memref<1x2x1xf32, #tpu.memory_space<vmem>>, vector<1x2x1xf32>
    %cst_21 = arith.constant dense<0.000000e+00> : vector<2xf32>
    %78 = vector.multi_reduction <add>, %76, %cst_21 [1] : vector<2x8xf32> to vector<2xf32>
    %79 = vector.shape_cast %78 : vector<2xf32> to vector<2x1xf32>
    %80 = vector.shape_cast %79 : vector<2x1xf32> to vector<1x2x1xf32>
    %81 = arith.addf %77, %80 : vector<1x2x1xf32>
    %c0_22 = arith.constant 0 : index
    %c0_23 = arith.constant 0 : index
    %c0_24 = arith.constant 0 : index
    %82 = vector.load %arg6[%c0_22, %c0_23, %c0_24] : memref<1x2x1xf32, #tpu.memory_space<vmem>>, vector<1x2x1xf32>
    tpu.vector_store %arg6[%c0_22, %c0_23, %c0_24], %81 {strides = array<i32>} : memref<1x2x1xf32, #tpu.memory_space<vmem>>, vector<1x2x1xf32>,
    %c0_25 = arith.constant 0 : index
    %c0_26 = arith.constant 0 : index
    %c0_27 = arith.constant 0 : index
    %83 = vector.load %arg7[%c0_25, %c0_26, %c0_27] : memref<1x2x1xf32, #tpu.memory_space<vmem>>, vector<1x2x1xf32>
    %cst_28 = arith.constant dense<0.000000e+00> : vector<2xf32>
    %84 = vector.multi_reduction <add>, %74, %cst_28 [1] : vector<2x8xf32> to vector<2xf32>
    %85 = vector.shape_cast %84 : vector<2xf32> to vector<2x1xf32>
    %86 = vector.shape_cast %85 : vector<2x1xf32> to vector<1x2x1xf32>
    %87 = arith.addf %83, %86 : vector<1x2x1xf32>
    %c0_29 = arith.constant 0 : index
    %c0_30 = arith.constant 0 : index
    %c0_31 = arith.constant 0 : index
    %88 = vector.load %arg7[%c0_29, %c0_30, %c0_31] : memref<1x2x1xf32, #tpu.memory_space<vmem>>, vector<1x2x1xf32>
    tpu.vector_store %arg7[%c0_29, %c0_30, %c0_31], %87 {strides = array<i32>} : memref<1x2x1xf32, #tpu.memory_space<vmem>>, vector<1x2x1xf32>,
    return
  }
  func.func @transform_0(%arg0: i32, %arg1: i32, %arg2: i32) -> (i32, i32, i32) {
    %c1_i32 = arith.constant 1 : i32
    %0 = arith.muli %arg0, %c1_i32 : i32
    %1 = arith.addi %0, %arg2 : i32
    %c0_i32 = arith.constant 0 : i32
    %c0_i32_0 = arith.constant 0 : i32
    return %c0_i32, %arg1, %1 : i32, i32, i32
  }
  func.func @transform_1(%arg0: i32, %arg1: i32, %arg2: i32) -> (i32, i32) {
    %c1_i32 = arith.constant 1 : i32
    %0 = arith.muli %arg0, %c1_i32 : i32
    %1 = arith.addi %0, %arg2 : i32
    %c0_i32 = arith.constant 0 : i32
    return %arg1, %1 : i32, i32
  }
  func.func @transform_2(%arg0: i32, %arg1: i32, %arg2: i32) -> (i32, i32) {
    %c1_i32 = arith.constant 1 : i32
    %0 = arith.muli %arg0, %c1_i32 : i32
    %1 = arith.addi %0, %arg2 : i32
    %c0_i32 = arith.constant 0 : i32
    return %arg1, %1 : i32, i32
  }
  func.func @transform_3(%arg0: i32, %arg1: i32, %arg2: i32) -> (i32, i32, i32) {
    %c0_i32 = arith.constant 0 : i32
    %c0_i32_0 = arith.constant 0 : i32
    return %arg0, %arg1, %c0_i32 : i32, i32, i32
  }
  func.func @transform_4(%arg0: i32, %arg1: i32, %arg2: i32) -> (i32, i32, i32) {
    %c0_i32 = arith.constant 0 : i32
    %c0_i32_0 = arith.constant 0 : i32
    return %arg0, %arg1, %c0_i32 : i32, i32, i32
  }
}

</mosaic_0001>

<bundles_post_ra>
// kernel: tpu_custom_call.1
= control target key start
LH: loop header
LB: loop body
LE: loop exit
PB: predicated region body
PF: predicated region fallthrough
CT: control target
= control target key end

     0   :  { %10 = vsyncpa [#allocation3], 0  ;;  %s392_s0 = inlined_call_operand.hbm [shape: f32[8,2,8], index: 0, kind: input, shape index: {}]   ;;  %s393_s1 = inlined_call_operand.hbm [shape: s32[2,8], index: 1, kind: input, shape index: {}]   ;;  %s394_s2 = inlined_call_operand.vmem [shape: s8[2,8], index: 2, kind: input, shape index: {}]   ;;  %s395_s3 = inlined_call_operand.vmem [shape: f32[1,2,1], index: 3, kind: output, shape index: {0}]   ;;  %s396_s4 = inlined_call_operand.vmem [shape: f32[1,2,1], index: 4, kind: output, shape index: {1}]  }
   0x1   :  { %11 = vsyncpa [#allocation5], 0  ;;  %s268_s15 = smov [#allocation2]  }
   0x2   :  { %s20_s16 = sshll.u32 %s268_s15, 4  ;;  %s21_s16 = int_to_ptr.vmem [resolvable:$true] %s20_s16 }
   0x3   :  { %s232_s17 = scalar_lea.vmem %s21_s16, 256  ;;  %p237_p1 = scmp.lt.s32.totalorder %s21_s16, %s21_s16 }
   0x4   :  { %p233_p0 = scmp.ne.s32.totalorder %s21_s16, %s232_s17  ;;  %p238_p2 = scmp.lt.s32.totalorder %s232_s17, %s232_s17 }
   0x6   :  { %p239_p3 = por %p238_p2, %p237_p1 }
   0x8   :  { %p240_p4 = pnand %p239_p3, %p233_p0 }
   0xa   :  { %243 = shalt.err (!%p240_p4)
}
   0xb   :  { %s269_s18 = smov 32   ;;  %s270_s19 = smov 2  }
   0xc   :  { %26 = dma.hbm_to_vmem [thread:$0]  %s392_s0, 256, %s21_s16, [#allocation3], %s269_s18, %s269_s18, %s270_s19  }
   0xd   :  { %s271_s22 = smov [#allocation4]  }
   0xe   :  { %s36_s23 = sshll.u32 %s271_s22, 4  ;;  %s37_s23 = int_to_ptr.vmem [resolvable:$true] %s36_s23 }
   0xf   :  { %s252_s24 = scalar_lea.vmem %s37_s23, 32  ;;  %p257_p6 = scmp.lt.s32.totalorder %s37_s23, %s37_s23 }
  0x10   :  { %p253_p5 = scmp.ne.s32.totalorder %s37_s23, %s252_s24  ;;  %p258_p7 = scmp.lt.s32.totalorder %s252_s24, %s252_s24 }
  0x12   :  { %p259_p8 = por %p258_p7, %p257_p6 }
  0x14   :  { %p260_p9 = pnand %p259_p8, %p253_p5 }
  0x16   :  { %263 = shalt.err (!%p260_p9)
}
  0x17   :  { %39 = dma.hbm_to_vmem [thread:$0]  %s393_s1, 32, %s37_s23, [#allocation5]  }
  0x18   :  { %264 = dma.done.wait [#allocation3], 256  }
  0x19   :  { %265 = vsyncadd [#allocation3], 4294967040 }
  0x1a   :  { %266 = dma.done.wait [#allocation5], 32  }
  0x1b   :  { %267 = vsyncadd [#allocation5], 4294967264  ;;  %vm70_vm0 = vcmask 1024   ;;  %v272_v0 = vmov 0.0   ;;  %vm81_vm1 = vcmask 58368  }
  0x1c   :  { %71 = vst.msk [vmem:[%s395_s3] sm:$0x3] %vm70_vm0, %v272_v0  ;;  %72 = vst.msk [vmem:[%s396_s4] sm:$0x3] %vm70_vm0, %v272_v0  ;;  %v73_v1 = vld [vmem:[#allocation2] sm:$0x3] }
  0x1d   :  { %v74_v2 = vld [vmem:[#allocation2 + $0x2] sm:$0x3]  ;;  %v315_v3 = vld [vmem:[#allocation2 + $0x4] sm:$0x3]  ;;  %v317_v4 = vld [vmem:[#allocation2 + $0x6] sm:$0x3] }
  0x1e   :  { %v319_v5 = vld [vmem:[#allocation2 + $0x8] sm:$0x3]  ;;  %v321_v6 = vld [vmem:[#allocation2 + $0xa] sm:$0x3]  ;;  %v323_v7 = vld [vmem:[#allocation2 + $0xc] sm:$0x3] }
  0x1f   :  { %v325_v8 = vld [vmem:[#allocation2 + $0xe] sm:$0x3]  ;;  %v82_v9 = vsel %vm81_vm1, %v73_v1, -inf  ;;  %v83_v10 = vsel %vm81_vm1, %v74_v2, -inf  ;;  %v84_v11 = vsel %vm81_vm1, %v315_v3, -inf  ;;  %v85_v12 = vsel %vm81_vm1, %v317_v4, -inf }
  0x20   :  { %v86_v13 = vsel %vm81_vm1, %v319_v5, -inf  ;;  %v88_v14 = vsel %vm81_vm1, %v321_v6, -inf  ;;  %v90_v17 = vsel %vm81_vm1, %v323_v7, -inf  ;;  %v92_v18 = vsel %vm81_vm1, %v325_v8, -inf  ;;  %v139_v40 = vld [vmem:[#allocation4] sm:$0x3] }
  0x21   :  { %v87_v15 = vmax.f32 %v82_v9, %v86_v13  ;;  %v89_v16 = vmax.f32 %v83_v10, %v88_v14  ;;  %v91_v19 = vmax.f32 %v84_v11, %v90_v17  ;;  %v93_v20 = vmax.f32 %v85_v12, %v92_v18 }
  0x22   :  { %vm140_vm2 = vcmp.eq.s32.totalorder %v139_v40, 0  ;;  %vm143_vm3 = vcmp.eq.s32.totalorder %v139_v40, 1  ;;  %vm146_vm4 = vcmp.eq.s32.totalorder %v139_v40, 2  ;;  %vm149_vm5 = vcmp.eq.s32.totalorder %v139_v40, 3 }
  0x23   :  { %v94_v21 = vmax.f32 %v87_v15, %v89_v16  ;;  %v95_v22 = vmax.f32 %v91_v19, %v93_v20  ;;  %v141_v51 = vsel %vm140_vm2, %v73_v1, 0.0  ;;  %v144_v52 = vsel %vm143_vm3, %v74_v2, 0.0 }
  0x24   :  { %v145_v58 = vadd.f32 %v144_v52, %v141_v51  ;;  %v147_v60 = vsel %vm146_vm4, %v315_v3, 0.0  ;;  %v150_v10 = vsel %vm149_vm5, %v317_v4, 0.0  ;;  %vm152_vm6 = vcmp.eq.s32.totalorder %v139_v40, 4 }
  0x25   :  { %v341_v23 = vmax.f32 %v94_v21, %v95_v22  ;;  %v153_v14 = vsel %vm152_vm6, %v319_v5, 0.0  ;;  %vm155_vm7 = vcmp.eq.s32.totalorder %v139_v40, 5  ;;  %vm158_vm8 = vcmp.eq.s32.totalorder %v139_v40, 6 }
  0x26   :  { %v156_v16 = vsel %vm155_vm7, %v321_v6, 0.0  ;;  %v273_v18 = vmov 0   ;;  %vm161_vm10 = vcmp.eq.s32.totalorder %v139_v40, 7 }
  0x27   :  { %v97_v24 = vsub.f32 %v73_v1, %v341_v23  ;;  %v98_v25 = vsub.f32 %v74_v2, %v341_v23  ;;  %v99_v26 = vsub.f32 %v315_v3, %v341_v23  ;;  %v100_v27 = vsub.f32 %v317_v4, %v341_v23  ;;  %v164_v3 = vld [vmem:[%s394_s2] sm:$0x1] }
  0x28   :  { %v101_v28 = vsub.f32 %v319_v5, %v341_v23  ;;  %v102_v29 = vsub.f32 %v321_v6, %v341_v23  ;;  %v103_v33 = vsub.f32 %v323_v7, %v341_v23  ;;  %v104_v36 = vsub.f32 %v325_v8, %v341_v23 }
  0x29   :  { %v105_v30 = vmul.f32 1.442695, %v97_v24  ;;  %v107_v31 = vmul.f32 1.442695, %v98_v25  ;;  %v109_v32 = vmul.f32 1.442695, %v99_v26  ;;  %v148_v1 = vadd.f32 %v147_v60, %v145_v58 }
  0x2a   :  { %v111_v34 = vmul.f32 1.442695, %v100_v27  ;;  %v113_v35 = vmul.f32 1.442695, %v101_v28  ;;  %v115_v37 = vmul.f32 1.442695, %v102_v29  ;;  %vm165_vm9 = vnez %v164_v3 }
  0x2b   :  { %206 = vpow2.f32 %v105_v30  ;;  %v117_v38 = vmul.f32 1.442695, %v103_v33  ;;  %v119_v39 = vmul.f32 1.442695, %v104_v36  ;;  %v151_v13 = vadd.f32 %v150_v10, %v148_v1 }
  0x2c   :  { %208 = vpow2.f32 %v107_v31  ;;  %v159_v4 = vsel %vm158_vm8, %v323_v7, 0.0  ;;  %v166_v19 = vsel %vm165_vm9, 16843009, %v273_v18  ;;  %v162_v5 = vsel %vm161_vm10, %v325_v8, 0.0  ;;  %v173_v8 = vld [vmem:[%s395_s3] sm:$0x3] }
  0x2d   :  { %210 = vpow2.f32 %v109_v32  ;;  %v154_v15 = vadd.f32 %v153_v14, %v151_v13  ;;  %v167_v21 = vunpack.c.0.s8 %v166_v19 }
  0x2e   :  { %212 = vpow2.f32 %v111_v34 }
  0x2f   :  { %214 = vpow2.f32 %v113_v35  ;;  %v157_v17 = vadd.f32 %v156_v16, %v154_v15  ;;  %vm168_vm11 = vcmp.ne.s32.totalorder %v167_v21, 0 }
  0x30   :  { %216 = vpow2.f32 %v115_v37  ;;  %v199_v6 = vsel %vm168_vm11, 1.0, %v272_v0 }
  0x31   :  { %218 = vpow2.f32 %v117_v38  ;;  %v160_v20 = vadd.f32 %v159_v4, %v157_v17  ;;  %v181_v7 = vsel %vm81_vm1, %v199_v6, 0.0 }
  0x32   :  { %220 = vpow2.f32 %v119_v39 }
  0x33   :  { %v163_v25 = vadd.f32 %v162_v5, %v160_v20 }
  0x38   :  { %v207_v41 = vpop.eup %206 }
  0x39   :  { %v209_v42 = vpop.eup %208  ;;  %v121_v43 = vsel %vm81_vm1, %v207_v41, 0.0 }
  0x3a   :  { %v211_v44 = vpop.eup %210  ;;  %v122_v45 = vsel %vm81_vm1, %v209_v42, 0.0 }
  0x3b   :  { %v213_v46 = vpop.eup %212  ;;  %v123_v47 = vadd.f32 %v122_v45, %v121_v43  ;;  %v124_v48 = vsel %vm81_vm1, %v211_v44, 0.0 }
  0x3c   :  { %v215_v49 = vpop.eup %214  ;;  %v126_v50 = vsel %vm81_vm1, %v213_v46, 0.0 }
  0x3d   :  { %v217_v53 = vpop.eup %216  ;;  %v125_v54 = vadd.f32 %v124_v48, %v123_v47  ;;  %v128_v55 = vsel %vm81_vm1, %v215_v49, 0.0 }
  0x3e   :  { %v219_v56 = vpop.eup %218  ;;  %v130_v59 = vsel %vm81_vm1, %v217_v53, 0.0 }
  0x3f   :  { %v127_v57 = vadd.f32 %v126_v50, %v125_v54  ;;  %v221_v61 = vpop.eup %220  ;;  %v132_v63 = vsel %vm81_vm1, %v219_v56, 0.0 }
  0x40   :  { %v134_v2 = vsel %vm81_vm1, %v221_v61, 0.0 }
  0x41   :  { %v129_v62 = vadd.f32 %v128_v55, %v127_v57 }
  0x43   :  { %v131_v9 = vadd.f32 %v130_v59, %v129_v62 }
  0x45   :  { %v133_v11 = vadd.f32 %v132_v63, %v131_v9 }
  0x47   :  { %v135_v12 = vadd.f32 %v134_v2, %v133_v11 }
  0x49   :  { %222 = vlog2.f32 %v135_v12 }
  0x56   :  { %v223_v22 = vpop.eup %222 }
  0x57   :  { %v137_v24 = vmul.f32 0.6931472, %v223_v22 }
  0x59   :  { %v138_v26 = vadd.f32 %v137_v24, %v341_v23  ;;  %v180_v23 = vld [vmem:[%s396_s4] sm:$0x3] }
  0x5b   :  { %v171_v27 = vsub.f32 %v138_v26, %v163_v25 }
  0x5d   :  { %v172_v28 = vmul.f32 %v199_v6, %v171_v27 }
  0x5f   :  { %v174_v29 = vsel %vm81_vm1, %v172_v28, 0.0 }
  0x60   :  { %175 = vadd.xlane.f32.xlu0 %v174_v29 }
  0x64   :  { %182 = vadd.xlane.f32.xlu0 %v181_v7 }
  0xe9   :  { %v176_v30 = vpop.xlane.xlu0 %175 }
  0xea   :  { %v177_v31 = vadd.f32 %v176_v30, %v173_v8 }
  0xec   :  { %179 = vst.msk [vmem:[%s395_s3] sm:$0x3] %vm70_vm0, %v177_v31 }
  0xed   :  { %v183_v0 = vpop.xlane.xlu0 %182 }
  0xee   :  { %v184_v32 = vadd.f32 %v183_v0, %v180_v23 }
  0xf0   :  { %185 = vst.msk [vmem:[%s396_s4] sm:$0x3] %vm70_vm0, %v184_v32 }
  0xf1   :  { %194 = vsyncpa [#allocation3], 1 }
  0xf2   :  { %195 = vsyncpa [#allocation5], 1 }

</bundles_post_ra>
